<compile_context>
chip_gen: v7x
topology: tpu7x:2x2x1
jax: 0.10.0
libtpu: 0.0.40
codegen_flags: <defaults>
</compile_context>

<pallas_src>
import jax
import jax.numpy as jnp
from jax import lax
from jax.experimental import pallas as pl
from jax.experimental.pallas import tpu as pltpu


def loc_attn_kernel(key_ref, w_ref, b_ref, q_ref, out_ref):
    """One batch tile: fused linear+tanh, weighted sum over K, softmax over S."""
    tb, S, K = key_ref.shape

    # Flatten (tb, S, K) -> (tb*S, K): one MXU matmul filling tb*S sublane rows
    # instead of tb tiny (S, K) matmuls.
    key_flat = key_ref[...].reshape(tb * S, K)
    w = w_ref[...]            # (K_out, K_in)  -- torch nn.Linear layout, as-is
    b = b_ref[...]            # (1, K)
    q = q_ref[...]            # (S, K)         -- already sliced to seq_len

    # key @ W^T  (contract K_in of both operands), f32 accumulation on the MXU.
    proj = lax.dot_general(
        key_flat, w,
        dimension_numbers=(((1,), (1,)), ((), ())),
        preferred_element_type=jnp.float32,
    )                                             # (tb*S, K)
    wkey = jnp.tanh(proj + b).reshape(tb, S, K)   # EUP tanh, f32

    # score[b, s] = sum_k q[s, k] * Wkey[b, s, k]
    score = jnp.sum(q[None, :, :] * wkey, axis=-1)          # (tb, S)

    # Numerically stable softmax over the sequence axis (PyTorch dim=1).
    m = jnp.max(score, axis=-1, keepdims=True)
    e = jnp.exp(score - m)
    denom = jnp.sum(e, axis=-1, keepdims=True)
    # Exact reciprocal keeps the 1e-5 tolerance; approx=True would push the
    # op fully onto the (idle) EUP slot if tolerance allowed.
    out_ref[...] = e * pl.reciprocal(denom, approx=False)


def _pick_batch_tile(B, S, K):
    """Largest batch tile whose key block stays ~2 MiB (double-buffer safe on
    v7x's 64 MiB VMEM / 32 MiB scoped default on all chips)."""
    if B <= 8:
        return B
    rows = max(8, (2 * 1024 * 1024) // (S * K * 4))   # batch rows per ~2 MiB
    tb = (min(B, rows) // 8) * 8                      # sublane-friendly
    return max(8, tb)


def loc_attn_forward(key, weight, bias, q_param, *, batch_tile=None):
    """key: (B,S,K); weight: (K_out,K_in) torch-style; bias: (K,); q_param: (L,K)."""
    B, S, K = key.shape
    assert S <= q_param.shape[0], "seq_len exceeds max_length of q parameter"

    if batch_tile is None:
        batch_tile = _pick_batch_tile(B, S, K)
    num_blocks = pl.cdiv(B, batch_tile)

    b2d = bias.reshape(1, K)       # 2-D for TPU layout friendliness
    q_sl = q_param[:S, :]          # q[:seq_len, :]

    return pl.pallas_call(
        loc_attn_kernel,
        out_shape=jax.ShapeDtypeStruct((B, S), jnp.float32),
        grid=(num_blocks,),
        in_specs=[
            pl.BlockSpec((batch_tile, S, K), lambda i: (i, 0, 0)),  # key tile
            pl.BlockSpec((K, K), lambda i: (0, 0)),                 # weight
            pl.BlockSpec((1, K), lambda i: (0, 0)),                 # bias
            pl.BlockSpec((S, K), lambda i: (0, 0)),                 # q[:S]
        ],
        out_specs=pl.BlockSpec((batch_tile, S), lambda i: (i, 0)),
        compiler_params=pltpu.CompilerParams(
            dimension_semantics=("parallel",),      # v7x: 2 TCs split batch
        ),
    )(key, weight, b2d, q_sl)


def loc_attn_reference(key, weight, bias, q_param):
    """Pure-JAX reference mirroring the PyTorch forward."""
    wkey = jnp.tanh(jnp.einsum("bsk,ok->bso", key, weight) + bias)
    score = jnp.sum(q_param[: key.shape[1], :] * wkey, axis=2)
    return jax.nn.softmax(score, axis=1)


if __name__ == "__main__":
    # Small, deterministic problem: batch=2, seq=8, key_size=32, max_length=16
    B, S, K, L = 2, 8, 32, 16

    root = jax.random.PRNGKey(0)
    k_key, k_w, k_b, k_q = jax.random.split(root, 4)

    key = jax.random.normal(k_key, (B, S, K), dtype=jnp.float32)
    # nn.Linear(key_size, key_size): weight (K, K), bias (K,)
    weight = jax.random.uniform(k_w, (K, K), dtype=jnp.float32,
                                minval=-0.1, maxval=0.1)
    bias = jax.random.uniform(k_b, (K,), dtype=jnp.float32,
                              minval=-0.1, maxval=0.1)
    # nn.Parameter(torch.rand(max_length, key_size)): uniform [0, 1)
    q_param = jax.random.uniform(k_q, (L, K), dtype=jnp.float32)

    alpha = loc_attn_forward(key, weight, bias, q_param)
    alpha = jax.block_until_ready(alpha)

    ref = loc_attn_reference(key, weight, bias, q_param)
    assert alpha.shape == (B, S)
    assert jnp.allclose(alpha, ref, atol=1e-5, rtol=1e-5), "mismatch vs reference"

    print("KERNEL_OK")
</pallas_src>

<mosaic_0001>
module attributes {stable_mosaic.version = 11 : i64} {
  func.func @loc_attn_kernel(%arg0: i32, %arg1: memref<2x8x32xf32, #tpu.memory_space<vmem>>, %arg2: memref<32x32xf32, #tpu.memory_space<vmem>>, %arg3: memref<1x32xf32, #tpu.memory_space<vmem>>, %arg4: memref<8x32xf32, #tpu.memory_space<vmem>>, %arg5: memref<2x8xf32, #tpu.memory_space<vmem>>) attributes {dimension_semantics = [#tpu.dimension_semantics<parallel>], iteration_bounds = array<i64: 1>, scalar_prefetch = 0 : i64, scratch_operands = 0 : i64, tpu.core_type = #tpu.core_type<tc>, window_params = [{transform_indices = @transform_0, window_bounds = array<i64: 2, 8, 32>}, {pipeline_mode = #tpu.pipeline_mode<synchronous>, transform_indices = @transform_1, window_bounds = array<i64: 32, 32>}, {pipeline_mode = #tpu.pipeline_mode<synchronous>, transform_indices = @transform_2, window_bounds = array<i64: 1, 32>}, {pipeline_mode = #tpu.pipeline_mode<synchronous>, transform_indices = @transform_3, window_bounds = array<i64: 8, 32>}, {transform_indices = @transform_4, window_bounds = array<i64: 2, 8>}]} {
    %c0 = arith.constant 0 : index
    %c0_0 = arith.constant 0 : index
    %c0_1 = arith.constant 0 : index
    %0 = vector.load %arg1[%c0, %c0_0, %c0_1] : memref<2x8x32xf32, #tpu.memory_space<vmem>>, vector<2x8x32xf32>
    %1 = vector.shape_cast %0 : vector<2x8x32xf32> to vector<16x32xf32>
    %c0_2 = arith.constant 0 : index
    %c0_3 = arith.constant 0 : index
    %2 = vector.load %arg2[%c0_2, %c0_3] : memref<32x32xf32, #tpu.memory_space<vmem>>, vector<32x32xf32>
    %c0_4 = arith.constant 0 : index
    %c0_5 = arith.constant 0 : index
    %3 = vector.load %arg3[%c0_4, %c0_5] : memref<1x32xf32, #tpu.memory_space<vmem>>, vector<1x32xf32>
    %c0_6 = arith.constant 0 : index
    %c0_7 = arith.constant 0 : index
    %4 = vector.load %arg4[%c0_6, %c0_7] : memref<8x32xf32, #tpu.memory_space<vmem>>, vector<8x32xf32>
    %cst = arith.constant dense<0.000000e+00> : vector<16x32xf32>
    %5 = tpu.matmul %1, %2, %cst {dimension_numbers = #tpu.dot_dimension_numbers<[1], [1], [0], [0], [0, 0, 1, 0], [], []>} : vector<16x32xf32>, vector<32x32xf32>, vector<16x32xf32> -> vector<16x32xf32>
    %6 = vector.broadcast %3 : vector<1x32xf32> to vector<16x32xf32>
    %7 = arith.addf %5, %6 : vector<16x32xf32>
    %8 = math.tanh %7 : vector<16x32xf32>
    %9 = vector.shape_cast %8 : vector<16x32xf32> to vector<2x8x32xf32>
    %10 = vector.shape_cast %4 : vector<8x32xf32> to vector<1x8x32xf32>
    %11 = vector.broadcast %10 : vector<1x8x32xf32> to vector<2x8x32xf32>
    %12 = arith.mulf %11, %9 : vector<2x8x32xf32>
    %cst_8 = arith.constant dense<0.000000e+00> : vector<2x8xf32>
    %13 = vector.multi_reduction <add>, %12, %cst_8 [2] : vector<2x8x32xf32> to vector<2x8xf32>
    %cst_9 = arith.constant dense<0xFF800000> : vector<2xf32>
    %14 = vector.multi_reduction <maximumf>, %13, %cst_9 [1] : vector<2x8xf32> to vector<2xf32>
    %15 = vector.shape_cast %14 : vector<2xf32> to vector<2x1xf32>
    %16 = vector.broadcast %15 : vector<2x1xf32> to vector<2x8xf32>
    %17 = arith.subf %13, %16 : vector<2x8xf32>
    %18 = math.exp %17 : vector<2x8xf32>
    %cst_10 = arith.constant dense<0.000000e+00> : vector<2xf32>
    %19 = vector.multi_reduction <add>, %18, %cst_10 [1] : vector<2x8xf32> to vector<2xf32>
    %20 = vector.shape_cast %19 : vector<2xf32> to vector<2x1xf32>
    %21 = tpu.reciprocal %20 : vector<2x1xf32> -> vector<2x1xf32>
    %22 = vector.broadcast %21 : vector<2x1xf32> to vector<2x8xf32>
    %23 = arith.mulf %18, %22 : vector<2x8xf32>
    %c0_11 = arith.constant 0 : index
    %c0_12 = arith.constant 0 : index
    %24 = vector.load %arg5[%c0_11, %c0_12] : memref<2x8xf32, #tpu.memory_space<vmem>>, vector<2x8xf32>
    tpu.vector_store %arg5[%c0_11, %c0_12], %23 {strides = array<i32>} : memref<2x8xf32, #tpu.memory_space<vmem>>, vector<2x8xf32>,
    return
  }
  func.func @transform_0(%arg0: i32) -> (i32, i32, i32) {
    %c0_i32 = arith.constant 0 : i32
    %c0_i32_0 = arith.constant 0 : i32
    %c0_i32_1 = arith.constant 0 : i32
    return %arg0, %c0_i32, %c0_i32_0 : i32, i32, i32
  }
  func.func @transform_1(%arg0: i32) -> (i32, i32) {
    %c0_i32 = arith.constant 0 : i32
    %c0_i32_0 = arith.constant 0 : i32
    %c0_i32_1 = arith.constant 0 : i32
    return %c0_i32, %c0_i32_0 : i32, i32
  }
  func.func @transform_2(%arg0: i32) -> (i32, i32) {
    %c0_i32 = arith.constant 0 : i32
    %c0_i32_0 = arith.constant 0 : i32
    %c0_i32_1 = arith.constant 0 : i32
    return %c0_i32, %c0_i32_0 : i32, i32
  }
  func.func @transform_3(%arg0: i32) -> (i32, i32) {
    %c0_i32 = arith.constant 0 : i32
    %c0_i32_0 = arith.constant 0 : i32
    %c0_i32_1 = arith.constant 0 : i32
    return %c0_i32, %c0_i32_0 : i32, i32
  }
  func.func @transform_4(%arg0: i32) -> (i32, i32) {
    %c0_i32 = arith.constant 0 : i32
    %c0_i32_0 = arith.constant 0 : i32
    return %arg0, %c0_i32 : i32, i32
  }
}

</mosaic_0001>

<bundles_post_ra>
// kernel: tpu_custom_call.1
= control target key start
LH: loop header
LB: loop body
LE: loop exit
PB: predicated region body
PF: predicated region fallthrough
CT: control target
= control target key end

     0   :  { %9 = vsyncpa [#allocation3], 0  ;;  %s481_s0 = inlined_call_operand.hbm [shape: f32[2,8,32], index: 0, kind: input, shape index: {}]   ;;  %s482_s1 = inlined_call_operand.hbm [shape: f32[32,32], index: 1, kind: input, shape index: {}]   ;;  %s483_s2 = inlined_call_operand.vmem [shape: f32[1,32], index: 2, kind: input, shape index: {}]   ;;  %s484_s3 = inlined_call_operand.vmem [shape: f32[8,32], index: 3, kind: input, shape index: {}]   ;;  %s485_s4 = inlined_call_operand.hbm [shape: f32[2,8], index: 4, kind: output, shape index: {}]  }
   0x1   :  { %10 = vsyncpa [#allocation6], 0 }
   0x2   :  { %11 = vsyncpa [#allocation4], 0  ;;  %s396_s15 = smov [#allocation2]   ;;  %s324_s19 = scalar_lea.hbm %s481_s0, 256 }
   0x3   :  { %s17_s16 = sshll.u32 %s396_s15, 4  ;;  %p325_p0 = scmp.ne.s32.totalorder %s481_s0, %s324_s19  ;;  %s18_s16 = int_to_ptr.vmem [resolvable:$true] %s17_s16 }
   0x4   :  { %p328_p1 = scmp.lt.u32.totalorder %s324_s19, %s481_s0 }
   0x6   :  { %p330_p2 = pnand %p328_p1, %p325_p0 }
   0x8   :  { %333 = shalt.err (!%p330_p2)
}
   0x9   :  { %s334_s24 = scalar_lea.vmem %s18_s16, 256  ;;  %p339_p4 = scmp.lt.s32.totalorder %s18_s16, %s18_s16 }
   0xa   :  { %p335_p3 = scmp.ne.s32.totalorder %s18_s16, %s334_s24  ;;  %p340_p5 = scmp.lt.s32.totalorder %s334_s24, %s334_s24 }
   0xc   :  { %p341_p6 = por %p340_p5, %p339_p4 }
   0xe   :  { %p342_p7 = pnand %p341_p6, %p335_p3 }
  0x10   :  { %345 = shalt.err (!%p342_p7)
}
  0x11   :  { %s397_s25 = smov 128   ;;  %s398_s26 = smov 8  }
  0x12   :  { %23 = dma.hbm_to_vmem [thread:$0]  %s481_s0, 256, %s18_s16, [#allocation3], %s397_s25, %s397_s25, %s398_s26  }
  0x13   :  { %s399_s29 = smov [#allocation5]   ;;  %s346_s7 = scalar_lea.hbm %s482_s1, 512 }
  0x14   :  { %s29_s30 = sshll.u32 %s399_s29, 4  ;;  %p347_p8 = scmp.ne.s32.totalorder %s482_s1, %s346_s7  ;;  %s30_s30 = int_to_ptr.vmem [resolvable:$true] %s29_s30 }
  0x15   :  { %p350_p9 = scmp.lt.u32.totalorder %s346_s7, %s482_s1 }
  0x17   :  { %p352_p10 = pnand %p350_p9, %p347_p8 }
  0x19   :  { %355 = shalt.err (!%p352_p10)
}
  0x1a   :  { %s356_s12 = scalar_lea.vmem %s30_s30, 512  ;;  %p361_p12 = scmp.lt.s32.totalorder %s30_s30, %s30_s30 }
  0x1b   :  { %p357_p11 = scmp.ne.s32.totalorder %s30_s30, %s356_s12  ;;  %p362_p13 = scmp.lt.s32.totalorder %s356_s12, %s356_s12 }
  0x1d   :  { %p363_p0 = por %p362_p13, %p361_p12 }
  0x1f   :  { %p364_p1 = pnand %p363_p0, %p357_p11 }
  0x21   :  { %367 = shalt.err (!%p364_p1)
}
  0x22   :  { %35 = dma.hbm_to_vmem [thread:$0]  %s482_s1, 512, %s30_s30, [#allocation6], %s397_s25, %s397_s25, %s398_s26  }
  0x23   :  { %390 = dma.done.wait [#allocation3], 256  }
  0x24   :  { %391 = vsyncadd [#allocation3], 4294967040 }
  0x25   :  { %392 = dma.done.wait [#allocation6], 512  }
  0x26   :  { %393 = vsyncadd [#allocation6], 4294966784  ;;  %vm60_vm0 = vcmask 261120   ;;  %v48_v0 = vld [vmem:[#allocation5] sm:$0xff]  ;;  %v49_v1 = vld [vmem:[#allocation5 + $0x8] sm:$0xff]  ;;  %v166_v20 = vlaneseq  ;;  %vm176_vm2 = vcmask 1041409  }
  0x27   :  { %vm295_vm1 = vmpackc.low %vm60_vm0, %vm60_vm0  ;;  %v50_v2 = vld [vmem:[#allocation5 + $0x10] sm:$0xff]  ;;  %v294_v3 = vpack.c.bf16 %v49_v1, %v48_v0  ;;  %v51_v4 = vld [vmem:[#allocation5 + $0x18] sm:$0xff]  ;;  %vm179_vm3 = vcmask 58368   ;;  %v400_v30 = vmov 0  }
  0x28   :  { %v46_v5 = vld [vmem:[#allocation2] sm:$0xff]  ;;  %v300_v6 = vpack.c.bf16 %v51_v4, %v50_v2  ;;  %v47_v7 = vld [vmem:[#allocation2 + $0x8] sm:$0xff]  ;;  %v167_v21 = vand.u32 127, %v166_v20  ;;  %v169_v22 = vshrl.u32 %v166_v20, 7  ;;  %313 = vset.pattern.permute.xlu0 %v400_v30  ;;  %312 = vset.pattern.permute.xlu1 %v400_v30 }
  0x29   :  { %291 = vmatprep.mubr.msk.f32.mxu0 %vm60_vm0, %v46_v5  ;;  %296 = vmatprep.subr.msk.bf16.mxu0 %vm295_vm1, %v294_v3  ;;  %v270_v8 = vld [vmem:[%s483_s2] ss:$0 sm:$0xff]  ;;  %s401_s2 = smov [#allocation7]  }
  0x2a   :  { %299 = vmatpush3.bf16.xpose.msk.msra.mxu0 %vm295_vm1, %v294_v3  ;;  %v53_v13 = vld [vmem:[%s484_s3] sm:$0xff]  ;;  %v170_v24 = vsub.s32 %v167_v21, %v169_v22  ;;  %v186_v31 = vsub.s32 0, %v169_v22  ;;  %v190_v32 = vsub.s32 1, %v169_v22  ;;  %s260_s3 = sshll.u32 %s401_s2, 4  ;;  %s261_s3 = int_to_ptr.vmem [resolvable:$true] %s260_s3 }
  0x2b   :  { %302 = vmatprep.subr.msk.bf16.mxu0 %vm295_vm1, %v300_v6  ;;  %s368_s17 = scalar_lea.vmem %s261_s3, 32  ;;  %p373_p3 = scmp.lt.s32.totalorder %s261_s3, %s261_s3 }
  0x2c   :  { %p369_p2 = scmp.ne.s32.totalorder %s261_s3, %s368_s17  ;;  %p374_p4 = scmp.lt.s32.totalorder %s368_s17, %s368_s17 }
  0x2e   :  { %p375_p5 = por %p374_p4, %p373_p3 }
  0x30   :  { %p376_p6 = pnand %p375_p5, %p369_p2 }
  0x32   :  { %305 = vmatpush3.bf16.xpose.msk.msra.mxu0 %vm295_vm1, %v300_v6 }
  0x39   :  { %292 = vmatmul.mubr.msk.f32.vlgmr.msra.gmra.mrb[0].mxu0 %vm60_vm0, %v47_v7 }
 0x10c   :  { %v293_v9 = vpop.f32.mrb[0].mxu0 }
 0x10d   :  { %v151_v10 = vadd.f32 %v293_v9, %v270_v8  ;;  %v145_v11 = vpop.f32.mrb[1].mxu0 }
 0x10e   :  { %v146_v12 = vadd.f32 %v270_v8, %v145_v11 }
 0x10f   :  { %314 = vtanh.f32 %v151_v10 }
 0x110   :  { %316 = vtanh.f32 %v146_v12 }
 0x119   :  { %v315_v14 = vpop.eup %314 }
 0x11a   :  { %v317_v15 = vpop.eup %316  ;;  %v157_v18 = vmul.f32 %v315_v14, %v53_v13 }
 0x11b   :  { %v156_v16 = vmul.f32 %v317_v15, %v53_v13 }
 0x11c   :  { %v161_v19 = vsel %vm60_vm0, %v157_v18, 0.0 }
 0x11d   :  { %v158_v17 = vsel %vm60_vm0, %v156_v16, 0.0 }
 0x11e   :  { %159 = vadd.xlane.f32.xlu0 %v158_v17 }
 0x122   :  { %162 = vadd.xlane.f32.xlu0 %v161_v19 }
 0x1ab   :  { %v160_v23 = vpop.xlane.xlu0 %159 }
 0x1ac   :  { %v171_v26 = vrot.slane %v160_v23, %v170_v24 }
 0x1af   :  { %v163_v25 = vpop.xlane.xlu0 %162 }
 0x1b0   :  { %v175_v27 = vrot.slane %v163_v25, %v170_v24 }
 0x1b2   :  { %v177_v28 = vsel %vm176_vm2, %v175_v27, %v171_v26 }
 0x1b3   :  { %v180_v29 = vsel %vm179_vm3, %v177_v28, -inf }
 0x1b4   :  { %181 = vmax.xlane.f32.xlu1 %v180_v29 }
 0x241   :  { %v182_v33 = vpop.xlane.xlu1 %181 }
 0x242   :  { %v187_v34 = vrot.slane %v182_v33, %v186_v31  ;;  %v191_v35 = vrot.slane %v182_v33, %v190_v32 }
 0x244   :  { %v194_v36 = vsub.f32 %v160_v23, %v187_v34  ;;  %v195_v37 = vsub.f32 %v163_v25, %v191_v35 }
 0x246   :  { %v196_v38 = vmul.f32 1.442695, %v194_v36  ;;  %v198_v39 = vmul.f32 1.442695, %v195_v37 }
 0x248   :  { %318 = vpow2.f32 %v196_v38 }
 0x249   :  { %320 = vpow2.f32 %v198_v39 }
 0x252   :  { %v319_v40 = vpop.eup %318 }
 0x253   :  { %v321_v41 = vpop.eup %320  ;;  %203 = vperm.xlu1 %312, %v319_v40  }
 0x254   :  { %206 = vperm.xlu0 %313, %v321_v41  }
 0x2d2   :  { %v204_v42 = vpop.permute.xlu1 %203 }
 0x2d3   :  { %v207_v43 = vpop.permute.xlu0 %206  ;;  %v211_v44 = vrot.slane %v204_v42, %v170_v24 }
 0x2d4   :  { %v215_v45 = vrot.slane %v207_v43, %v170_v24 }
 0x2d6   :  { %v216_v46 = vsel %vm176_vm2, %v215_v45, %v211_v44 }
 0x2d7   :  { %v218_v47 = vsel %vm179_vm3, %v216_v46, 0.0 }
 0x2d8   :  { %219 = vadd.xlane.f32.xlu1 %v218_v47 }
 0x365   :  { %v220_v48 = vpop.xlane.xlu1 %219 }
 0x366   :  { %322 = vrcp.f32 %v220_v48 }
 0x370   :  { %v323_v49 = vpop.eup %322 }
 0x371   :  { %v226_v50 = vrot.slane %v323_v49, %v186_v31  ;;  %v230_v52 = vrot.slane %v323_v49, %v190_v32 }
 0x373   :  { %v233_v51 = vmul.f32 %v319_v40, %v226_v50  ;;  %v234_v53 = vmul.f32 %v321_v41, %v230_v52 }
 0x375   :  { %238 = vperm.xlu0 %313, %v233_v51  }
 0x379   :  { %241 = vperm.xlu0 %313, %v234_v53  }
 0x3f4   :  { %v239_v54 = vpop.permute.xlu0 %238 }
 0x3f5   :  { %v246_v56 = vrot.slane %v239_v54, %v170_v24 }
 0x3f8   :  { %v242_v55 = vpop.permute.xlu0 %241 }
 0x3f9   :  { %v250_v57 = vrot.slane %v242_v55, %v170_v24 }
 0x3fb   :  { %v251_v58 = vsel %vm176_vm2, %v250_v57, %v246_v56 }
 0x3fc   :  { %253 = vst.msk [vmem:[#allocation7] sm:$0x3] %vm179_vm3, %v251_v58 }
 0x3fd   :  { %379 = shalt.err (!%p376_p6)
}
 0x3fe   :  { %s380_s20 = scalar_lea.hbm %s485_s4, 32 }
 0x3ff   :  { %p381_p7 = scmp.ne.s32.totalorder %s485_s4, %s380_s20  ;;  %p384_p8 = scmp.lt.u32.totalorder %s380_s20, %s485_s4 }
 0x401   :  { %p386_p9 = pnand %p384_p8, %p381_p7 }
 0x403   :  { %389 = shalt.err (!%p386_p9)
}
 0x404   :  { %263 = dma.vmem_to_hbm [thread:$0]  %s261_s3, 32, %s485_s4, [#allocation4]  }
 0x405   :  { %394 = dma.done.wait [#allocation4], 32  }
 0x406   :  { %395 = vsyncadd [#allocation4], 4294967264 }
 0x407   :  { %267 = vsyncpa [#allocation3], 1 }
 0x408   :  { %268 = vsyncpa [#allocation6], 1 }
 0x409   :  { %269 = vsyncpa [#allocation4], 1 }

</bundles_post_ra>
